<compile_context>
chip_gen: v5e
topology: v5e:2x2
jax: 0.10.0
libtpu: 0.0.40
codegen_flags: <defaults>
</compile_context>

<pallas_src>
import jax
import jax.numpy as jnp
from jax import lax
from jax.experimental import pallas as pl
from jax.experimental.pallas import tpu as pltpu


def _linear_kernel_multi_k(x_ref, w_ref, b_ref, o_ref, acc_ref):
    """General path: K reduction spans several tiles; accumulate in f32 VMEM."""
    k = pl.program_id(2)

    @pl.when(k == 0)
    def _():
        acc_ref[...] = jnp.zeros_like(acc_ref)

    # x tile: (tm, tk); w tile: (tn, tk) in PyTorch (D_out, D_in) layout.
    # Contract over the shared D_in axis — transpose folded into the MXU op.
    acc_ref[...] += lax.dot_general(
        x_ref[...], w_ref[...],
        dimension_numbers=(((1,), (1,)), ((), ())),
        preferred_element_type=jnp.float32,
    )

    @pl.when(k == pl.num_programs(2) - 1)
    def _():
        # Bias added exactly once, in the finalize branch only.
        o_ref[...] = (acc_ref[...] + b_ref[...]).astype(o_ref.dtype)


def _linear_kernel_single_k(x_ref, w_ref, b_ref, o_ref):
    """Fast path: whole D_in fits in one K tile — no accumulator scratch."""
    acc = lax.dot_general(
        x_ref[...], w_ref[...],
        dimension_numbers=(((1,), (1,)), ((), ())),
        preferred_element_type=jnp.float32,
    )
    o_ref[...] = (acc + b_ref[...]).astype(o_ref.dtype)


def _round_up(v, m):
    return ((v + m - 1) // m) * m


def linear_pallas(x, weight, bias, *, tm=None, tn=None, tk=None):
    """y = x @ weight.T + bias  (PyTorch nn.Linear semantics).

    x:      (B, D_in)     float32
    weight: (D_out, D_in) float32  (PyTorch layout, NOT transposed)
    bias:   (D_out,)      float32
    returns (B, D_out)    float32
    """
    B, D_in = x.shape
    D_out = weight.shape[0]

    # Tile sizes: sublane-aligned M, lane-aligned N/K. Caps match MXU-native
    # tile multiples (256 is native on v6e/v7x and a multiple of v5e's 128),
    # and with tk up to 1024 the double-buffered tile set stays ~4.5 MiB —
    # tiny relative to even v7x's 64 MiB VMEM.
    tm = tm or min(256, _round_up(B, 8))
    tn = tn or min(256, _round_up(D_out, 128))
    tk = tk or min(1024, _round_up(D_in, 128))

    # Zero-pad to tile multiples -> lane-dense output, no masked stores.
    Bp = _round_up(B, tm)
    Np = _round_up(D_out, tn)
    Kp = _round_up(D_in, tk)

    x_p = x if (Bp == B and Kp == D_in) else jnp.pad(
        x, ((0, Bp - B), (0, Kp - D_in)))
    w_p = weight if (Np == D_out and Kp == D_in) else jnp.pad(
        weight, ((0, Np - D_out), (0, Kp - D_in)))
    b_p = (bias if Np == D_out else jnp.pad(bias, (0, Np - D_out))).reshape(1, Np)

    grid = (Bp // tm, Np // tn, Kp // tk)
    single_k = grid[2] == 1

    in_specs = [
        pl.BlockSpec((tm, tk), lambda i, j, k: (i, k)),   # x
        pl.BlockSpec((tn, tk), lambda i, j, k: (j, k)),   # weight (PyTorch layout)
        pl.BlockSpec((1, tn), lambda i, j, k: (0, j)),    # bias slice per N-tile
    ]
    out_spec = pl.BlockSpec((tm, tn), lambda i, j, k: (i, j))

    # TODO(synk): optionally cast x/w to bfloat16 for 2-4x MXU throughput once
    # the probing accuracy budget allows; kept f32 here for exact nn.Linear parity.
    out = pl.pallas_call(
        _linear_kernel_single_k if single_k else _linear_kernel_multi_k,
        out_shape=jax.ShapeDtypeStruct((Bp, Np), x.dtype),
        grid_spec=pltpu.PrefetchScalarGridSpec(
            num_scalar_prefetch=0,
            grid=grid,
            in_specs=in_specs,
            out_specs=out_spec,
            scratch_shapes=(
                [] if single_k else [pltpu.VMEM((tm, tn), jnp.float32)]
            ),
        ),
        compiler_params=pltpu.CompilerParams(
            dimension_semantics=("parallel", "parallel", "arbitrary"),
            vmem_limit_bytes=32 * 1024 * 1024,  # safe on v5e/v6e/v7x, ample headroom
        ),
    )(x_p, w_p, b_p)

    return out[:B, :D_out]


if __name__ == "__main__":
    # Small shapes implied by the forward: x is (batch, D_in) -> (batch, D_out).
    B, D_in, D_out = 8, 32, 16

    key = jax.random.PRNGKey(0)
    kx, kw, kb = jax.random.split(key, 3)

    # Deterministic parameter init mirroring nn.Linear default (uniform +-1/sqrt(D_in)).
    bound = 1.0 / jnp.sqrt(jnp.float32(D_in))
    weight = jax.random.uniform(kw, (D_out, D_in), jnp.float32, -bound, bound)
    bias = jax.random.uniform(kb, (D_out,), jnp.float32, -bound, bound)

    x = jax.random.normal(kx, (B, D_in), jnp.float32)

    y = linear_pallas(x, weight, bias)
    jax.block_until_ready(y)

    # Correctness check against plain JAX reference.
    y_ref = x @ weight.T + bias
    assert y.shape == (B, D_out)
    assert jnp.allclose(y, y_ref, atol=1e-5, rtol=1e-5)

    # Larger, multi-tile configuration exercising the K-accumulation path
    # (D_in > tk cap forces multiple K tiles when tk is overridden).
    B2, D_in2, D_out2 = 384, 1536, 640
    k2x, k2w, k2b = jax.random.split(jax.random.PRNGKey(1), 3)
    bound2 = 1.0 / jnp.sqrt(jnp.float32(D_in2))
    w2 = jax.random.uniform(k2w, (D_out2, D_in2), jnp.float32, -bound2, bound2)
    b2 = jax.random.uniform(k2b, (D_out2,), jnp.float32, -bound2, bound2)
    x2 = jax.random.normal(k2x, (B2, D_in2), jnp.float32)
    y2 = linear_pallas(x2, w2, b2, tk=512)   # 3 K tiles -> multi-K kernel path
    jax.block_until_ready(y2)
    y2_ref = x2 @ w2.T + b2
    assert y2.shape == (B2, D_out2)
    assert jnp.allclose(y2, y2_ref, atol=1e-4, rtol=1e-4)

    print("KERNEL_OK")
</pallas_src>

<mosaic_0001>
module attributes {stable_mosaic.version = 11 : i64} {
  func.func @_linear_kernel_single_k(%arg0: i32, %arg1: i32, %arg2: i32, %arg3: memref<8x128xf32, #tpu.memory_space<vmem>>, %arg4: memref<128x128xf32, #tpu.memory_space<vmem>>, %arg5: memref<1x128xf32, #tpu.memory_space<vmem>>, %arg6: memref<8x128xf32, #tpu.memory_space<vmem>>) attributes {dimension_semantics = [#tpu.dimension_semantics<parallel>, #tpu.dimension_semantics<parallel>, #tpu.dimension_semantics<arbitrary>], iteration_bounds = array<i64: 1, 1, 1>, scalar_prefetch = 0 : i64, scratch_operands = 0 : i64, tpu.core_type = #tpu.core_type<tc>, window_params = [{transform_indices = @transform_0, window_bounds = array<i64: 8, 128>}, {transform_indices = @transform_1, window_bounds = array<i64: 128, 128>}, {transform_indices = @transform_2, window_bounds = array<i64: 1, 128>}, {transform_indices = @transform_3, window_bounds = array<i64: 8, 128>}]} {
    %c0 = arith.constant 0 : index
    %c0_0 = arith.constant 0 : index
    %0 = vector.load %arg3[%c0, %c0_0] : memref<8x128xf32, #tpu.memory_space<vmem>>, vector<8x128xf32>
    %c0_1 = arith.constant 0 : index
    %c0_2 = arith.constant 0 : index
    %1 = vector.load %arg4[%c0_1, %c0_2] : memref<128x128xf32, #tpu.memory_space<vmem>>, vector<128x128xf32>
    %cst = arith.constant dense<0.000000e+00> : vector<8x128xf32>
    %2 = tpu.matmul %0, %1, %cst {dimension_numbers = #tpu.dot_dimension_numbers<[1], [1], [0], [0], [0, 0, 1, 0], [], []>} : vector<8x128xf32>, vector<128x128xf32>, vector<8x128xf32> -> vector<8x128xf32>
    %c0_3 = arith.constant 0 : index
    %c0_4 = arith.constant 0 : index
    %3 = vector.load %arg5[%c0_3, %c0_4] : memref<1x128xf32, #tpu.memory_space<vmem>>, vector<1x128xf32>
    %4 = vector.broadcast %3 : vector<1x128xf32> to vector<8x128xf32>
    %5 = arith.addf %2, %4 : vector<8x128xf32>
    %c0_5 = arith.constant 0 : index
    %c0_6 = arith.constant 0 : index
    %6 = vector.load %arg6[%c0_5, %c0_6] : memref<8x128xf32, #tpu.memory_space<vmem>>, vector<8x128xf32>
    tpu.vector_store %arg6[%c0_5, %c0_6], %5 {strides = array<i32>} : memref<8x128xf32, #tpu.memory_space<vmem>>, vector<8x128xf32>,
    return
  }
  func.func @transform_0(%arg0: i32, %arg1: i32, %arg2: i32) -> (i32, i32) {
    %c0_i32 = arith.constant 0 : i32
    return %arg0, %arg2 : i32, i32
  }
  func.func @transform_1(%arg0: i32, %arg1: i32, %arg2: i32) -> (i32, i32) {
    %c0_i32 = arith.constant 0 : i32
    return %arg1, %arg2 : i32, i32
  }
  func.func @transform_2(%arg0: i32, %arg1: i32, %arg2: i32) -> (i32, i32) {
    %c0_i32 = arith.constant 0 : i32
    %c0_i32_0 = arith.constant 0 : i32
    return %c0_i32, %arg1 : i32, i32
  }
  func.func @transform_3(%arg0: i32, %arg1: i32, %arg2: i32) -> (i32, i32) {
    %c0_i32 = arith.constant 0 : i32
    return %arg0, %arg1 : i32, i32
  }
}

</mosaic_0001>

<bundles_post_ra>
// kernel: tpu_custom_call.1
= control target key start
LH: loop header
LB: loop body
LE: loop exit
PB: predicated region body
PF: predicated region fallthrough
CT: control target
= control target key end

     0   :  { %8 = vsyncpa [#allocation3], 0  ;;  %s226_s0 = inlined_call_operand.hbm [shape: f32[8,128], index: 0, kind: input, shape index: {}]   ;;  %s227_s1 = inlined_call_operand.hbm [shape: f32[128,128], index: 1, kind: input, shape index: {}]   ;;  %s228_s2 = inlined_call_operand.vmem [shape: f32[1,128], index: 2, kind: input, shape index: {}]   ;;  %s229_s3 = inlined_call_operand.hbm [shape: f32[8,128], index: 3, kind: output, shape index: {}]  }
   0x1   :  { %9 = vsyncpa [#allocation6], 0 }
   0x2   :  { %10 = vsyncpa [#allocation4], 0  ;;  %s16_s14 = sshll.u32 %s226_s0, 4  ;;  %s189_s15 = smov [#allocation2]   ;;  %s17_s14 = int_to_ptr.hbm [resolvable:$true] %s16_s14 }
   0x3   :  { %s18_s16 = sshll.u32 %s189_s15, 4  ;;  %s26_s19 = sshll.u32 %s227_s1, 4  ;;  %s19_s16 = int_to_ptr.vmem [resolvable:$true] %s18_s16  ;;  %s27_s19 = int_to_ptr.hbm [resolvable:$true] %s26_s19 }
   0x4   :  { %21 = dma.hbm_to_vmem [thread:$0]  %s17_s14, 128, %s19_s16, [#allocation3]  }
   0x5   :  { %s190_s20 = smov [#allocation5]   ;;  %s191_s22 = smov 128  }
   0x6   :  { %s28_s21 = sshll.u32 %s190_s20, 4  ;;  %s192_s23 = smov 8   ;;  %s29_s21 = int_to_ptr.vmem [resolvable:$true] %s28_s21 }
   0x7   :  { %34 = dma.hbm_to_vmem [thread:$0]  %s27_s19, 2048, %s29_s21, [#allocation6], %s191_s22, %s191_s22, %s192_s23  }
   0x8   :  { %183 = dma.done.wait [#allocation3], 128  }
   0x9   :  { %184 = vsyncadd [#allocation3], 4294967168 }
   0xa   :  { %185 = dma.done.wait [#allocation6], 2048  }
   0xb   :  { %186 = vsyncadd [#allocation6], 4294965248  ;;  %v61_v0 = vld [vmem:[#allocation5 + $0x78] sm:$0xff]  ;;  %v60_v1 = vld [vmem:[#allocation5 + $0x70] sm:$0xff]  ;;  %s193_s24 = smov [#allocation7]   ;;  %s94_s28 = sshll.u32 %s229_s3, 4  ;;  %s95_s28 = int_to_ptr.hbm [resolvable:$true] %s94_s28 }
   0xc   :  { %66 = vmatpush.xpose.msra.mxu0 %v61_v0  ;;  %v59_v2 = vld [vmem:[#allocation5 + $0x68] sm:$0xff]  ;;  %v58_v3 = vld [vmem:[#allocation5 + $0x60] sm:$0xff]  ;;  %v57_v4 = vld [vmem:[#allocation5 + $0x58] sm:$0xff]  ;;  %s92_s25 = sshll.u32 %s193_s24, 4  ;;  %s93_s25 = int_to_ptr.vmem [resolvable:$true] %s92_s25 }
   0xd   :  { %v56_v5 = vld [vmem:[#allocation5 + $0x50] sm:$0xff]  ;;  %v55_v6 = vld [vmem:[#allocation5 + $0x48] sm:$0xff]  ;;  %v54_v7 = vld [vmem:[#allocation5 + $0x40] sm:$0xff] }
   0xe   :  { %v53_v8 = vld [vmem:[#allocation5 + $0x38] sm:$0xff]  ;;  %v52_v9 = vld [vmem:[#allocation5 + $0x30] sm:$0xff]  ;;  %v51_v10 = vld [vmem:[#allocation5 + $0x28] sm:$0xff] }
   0xf   :  { %v50_v11 = vld [vmem:[#allocation5 + $0x20] sm:$0xff]  ;;  %v49_v12 = vld [vmem:[#allocation5 + $0x18] sm:$0xff]  ;;  %v48_v13 = vld [vmem:[#allocation5 + $0x10] sm:$0xff] }
  0x10   :  { %67 = vmatpush.xpose.msra.mxu0 %v60_v1  ;;  %v47_v14 = vld [vmem:[#allocation5 + $0x8] sm:$0xff]  ;;  %v46_v15 = vld [vmem:[#allocation5] sm:$0xff]  ;;  %v45_v16 = vld [vmem:[#allocation2] sm:$0xff] }
  0x11   :  { %v110_v17 = vld [vmem:[%s228_s2] ss:$0 sm:$0xff] }
  0x14   :  { %68 = vmatpush.xpose.msra.mxu0 %v59_v2 }
  0x18   :  { %69 = vmatpush.xpose.msra.mxu0 %v58_v3 }
  0x1c   :  { %70 = vmatpush.xpose.msra.mxu0 %v57_v4 }
  0x20   :  { %71 = vmatpush.xpose.msra.mxu0 %v56_v5 }
  0x24   :  { %72 = vmatpush.xpose.msra.mxu0 %v55_v6 }
  0x28   :  { %73 = vmatpush.xpose.msra.mxu0 %v54_v7 }
  0x2c   :  { %74 = vmatpush.xpose.msra.mxu0 %v53_v8 }
  0x30   :  { %75 = vmatpush.xpose.msra.mxu0 %v52_v9 }
  0x34   :  { %76 = vmatpush.xpose.msra.mxu0 %v51_v10 }
  0x38   :  { %77 = vmatpush.xpose.msra.mxu0 %v50_v11 }
  0x3c   :  { %78 = vmatpush.xpose.msra.mxu0 %v49_v12 }
  0x40   :  { %79 = vmatpush.xpose.msra.mxu0 %v48_v13 }
  0x44   :  { %80 = vmatpush.xpose.msra.mxu0 %v47_v14 }
  0x48   :  { %81 = vmatpush.xpose.msra.mxu0 %v46_v15 }
  0x4b   :  { %82 = vmatmul.f32.vlgmr.msra.gmra.mxu0 %v45_v16 }
  0xc8   :  { %v83_v18 = vpop.f32.mrf.mxu0 }
  0xc9   :  { %v84_v19 = vadd.f32 %v110_v17, %v83_v18 }
  0xcb   :  { %86 = vst [vmem:[#allocation7] sm:$0xff] %v84_v19 }
  0xcc   :  { %97 = dma.vmem_to_hbm [thread:$0]  %s93_s25, 128, %s95_s28, [#allocation4]  }
  0xcd   :  { %187 = dma.done.wait [#allocation4], 128  }
  0xce   :  { %188 = vsyncadd [#allocation4], 4294967168 }
  0xcf   :  { %102 = vsyncpa [#allocation3], 1 }
  0xd0   :  { %103 = vsyncpa [#allocation6], 1 }
  0xd1   :  { %104 = vsyncpa [#allocation4], 1 }

</bundles_post_ra>
